<compile_context>
chip_gen: v7x
topology: tpu7x:2x2x1
jax: 0.10.0
libtpu: 0.0.40
codegen_flags: <defaults>
</compile_context>

<pallas_src>
import functools
import math

import jax
import jax.numpy as jnp
from jax import lax
from jax.experimental import pallas as pl
from jax.experimental.pallas import tpu as pltpu


def _round_up(a: int, b: int) -> int:
    return (a + b - 1) // b * b


def _tpu_config():
    """Generation-aware defaults: (row tile, hidden tile, MXU align, cores, VMEM budget)."""
    kind = ""
    try:
        kind = jax.devices()[0].device_kind.lower()
    except Exception:
        pass
    vmem_cap = None
    try:
        info = pltpu.get_tpu_info()
        vmem_cap = int(getattr(info, "vmem_capacity_bytes", 0)) or None
    except Exception:
        vmem_cap = None

    if "v7" in kind:
        # 64 MiB VMEM/TC, 2 TCs, ~3.2 TB/s HBM: tm=768 clears the compute-bound
        # threshold; never request the full physical VMEM (compiler scratch).
        cfg = dict(tm=768, th=256, align=256, cores=2,
                   vmem_cap=vmem_cap or 64 * 2**20, headroom=0.80)
    elif "v6" in kind:
        # 918 TF/s vs ~1.4 TB/s HBM -> need ~tm>=700 FLOP/byte to be MXU-bound.
        cfg = dict(tm=1024, th=512, align=256, cores=1,
                   vmem_cap=vmem_cap or 128 * 2**20, headroom=0.85)
    elif "v5" in kind:
        # ~240 FLOP/byte threshold: tm=256 already compute-bound; 4x128^2 MXU.
        cfg = dict(tm=256, th=512, align=128, cores=1,
                   vmem_cap=vmem_cap or 128 * 2**20, headroom=0.85)
    else:
        cfg = dict(tm=512, th=256, align=128, cores=1,
                   vmem_cap=vmem_cap or 64 * 2**20, headroom=0.80)
    return cfg


def _pick_hidden_tile(H_pad: int, max_th: int) -> int:
    """Largest lane-aligned hidden tile that divides H_pad (H_pad is a 128-multiple)."""
    for cand in (512, 256, 128):
        if cand <= max_th and H_pad % cand == 0:
            return cand
    return 128


def _mlp_kernel(x_ref, w1_ref, b1_ref, w2_ref, b2_ref, o_ref, acc_ref, *,
                approximate_gelu: bool, compute_dtype):
    # x_ref:  (tm, C)   row tile of flattened input (original dtype; cast here)
    # w1_ref: (C, th)   c_fc weight column tile (compute dtype)
    # b1_ref: (1, th)   c_fc bias tile (f32)
    # w2_ref: (th, C)   c_proj weight row tile (compute dtype)
    # b2_ref: (1, C)    c_proj bias (f32)
    # o_ref:  (tm, C)   output row tile
    # acc_ref:(tm, C)   f32 accumulator, resident across the hidden grid axis
    j = pl.program_id(1)

    @pl.when(j == 0)
    def _init():
        acc_ref[...] = jnp.zeros_like(acc_ref)

    # Cast on the VPU inside the kernel (hidden under the MXU) instead of an
    # extra HBM read/write pass in the wrapper.
    x = x_ref[...].astype(compute_dtype)
    h = jnp.dot(x, w1_ref[...], preferred_element_type=jnp.float32) + b1_ref[...]
    if approximate_gelu:
        # tanh approximation -> EUP (separate VLIW slot, effectively free)
        h = jax.nn.gelu(h, approximate=True)
    else:
        # exact GELU (nn.GELU default): 0.5*x*(1 + erf(x/sqrt(2)))
        h = 0.5 * h * (1.0 + lax.erf(h * (1.0 / math.sqrt(2.0))))
    acc_ref[...] += jnp.dot(h.astype(compute_dtype), w2_ref[...],
                            preferred_element_type=jnp.float32)

    @pl.when(j == pl.num_programs(1) - 1)
    def _finalize():
        # TODO(synk): dropout is identity here (inference / p=0); a training
        # mask would use pltpu.prng_seed + pltpu.prng_random_bits.
        o_ref[...] = (acc_ref[...] + b2_ref[...]).astype(o_ref.dtype)


def prepare_params(w_fc, b_fc, w_proj, b_proj, compute_dtype=jnp.bfloat16):
    """Cast weights to the MXU compute dtype ONCE (hoisted out of the per-call path)."""
    cdt = jnp.dtype(compute_dtype)
    return (w_fc.astype(cdt), b_fc.astype(jnp.float32),
            w_proj.astype(cdt), b_proj.astype(jnp.float32))


def mlp_forward(x, w_fc, b_fc, w_proj, b_proj, *,
                compute_dtype=None, out_dtype=None,
                approximate_gelu=False, tm=None, th=None):
    """x: (B, T, C). Weights in (in, out) layout (ideally pre-cast via prepare_params)."""
    B, T, C = x.shape
    H = w_fc.shape[1]  # 4*C
    assert w_fc.shape == (C, H) and w_proj.shape == (H, C)

    cfg = _tpu_config()
    out_dtype = jnp.dtype(out_dtype) if out_dtype is not None else jnp.dtype(x.dtype)
    # Compute dtype: whatever the weights were prepared in, unless overridden.
    cdt = jnp.dtype(compute_dtype) if compute_dtype is not None else jnp.dtype(w_fc.dtype)

    # ---- operands -------------------------------------------------------------
    # Weights: no-op if already prepared in cdt (the recommended path).
    w1 = w_fc.astype(cdt)
    w2 = w_proj.astype(cdt)
    b1 = b_fc.reshape(1, H).astype(jnp.float32)
    b2 = b_proj.reshape(1, C).astype(jnp.float32)

    # Pad hidden dim to a lane multiple with zeros if needed (zero columns of W1
    # / zero rows of W2 contribute exactly 0 to the accumulator).
    H_pad = _round_up(H, 128)
    if H_pad != H:
        # TODO(synk): hoist this rare padding into prepare_params for repeated calls.
        w1 = jnp.pad(w1, ((0, 0), (0, H_pad - H)))
        b1 = jnp.pad(b1, ((0, 0), (0, H_pad - H)))
        w2 = jnp.pad(w2, ((0, H_pad - H), (0, 0)))

    # Rows: no full row-tile pad; only <=7 rows for sublane alignment. The
    # ragged last row block is handled by the grid (OOB writes are masked).
    N = B * T
    N8 = _round_up(N, 8)
    x2 = x.reshape(N, C)
    if N8 != N:
        x2 = jnp.pad(x2, ((0, N8 - N), (0, 0)))

    # ---- tiling ---------------------------------------------------------------
    align = cfg["align"]
    tm_req = tm if tm is not None else cfg["tm"]
    if N8 >= align:
        tm_eff = min(_round_up(tm_req, align), _round_up(N8, align))
    else:
        tm_eff = N8  # tiny problem: one full-extent row block
    th_eff = _pick_hidden_tile(H_pad, th if th is not None else cfg["th"])

    # v7x megacore: make sure the "parallel" row axis has >= 2 blocks.
    if cfg["cores"] > 1:
        while pl.cdiv(N8, tm_eff) < cfg["cores"] and tm_eff > align:
            tm_eff = max(align, (tm_eff // 2) // align * align)

    # ---- VMEM budget (generation-aware) & tile auto-shrink ----------------------
    xs = jnp.dtype(x2.dtype).itemsize
    ws = jnp.dtype(w1.dtype).itemsize
    os_ = out_dtype.itemsize

    def step_vmem(tm_e, th_e):
        return (2 * tm_e * C * xs            # x tiles (double-buffered)
                + 2 * tm_e * C * os_         # out tiles
                + 2 * C * th_e * ws          # W1 tiles
                + 2 * th_e * C * ws          # W2 tiles
                + 2 * th_e * 4 + 2 * C * 4   # biases
                + tm_e * C * 4               # f32 accumulator scratch
                + 2 * tm_e * th_e * 4)       # f32 intermediate h (+ slack)

    budget = int(cfg["vmem_cap"] * cfg["headroom"])
    row_floor = align if N8 >= align else 8
    while step_vmem(tm_eff, th_eff) > budget and tm_eff > row_floor:
        quantum = align if tm_eff // 2 >= align else 8
        tm_eff = max(row_floor, (tm_eff // 2) // quantum * quantum)
    while step_vmem(tm_eff, th_eff) > budget and th_eff > 128:
        smaller = [c for c in (256, 128) if c < th_eff and H_pad % c == 0]
        if not smaller:
            break
        th_eff = smaller[0]

    grid = (pl.cdiv(N8, tm_eff), H_pad // th_eff)
    vmem_limit = int(min(budget, max(32 * 2**20, int(1.25 * step_vmem(tm_eff, th_eff)))))

    # ---- cost estimate (includes weight re-streaming: grid[0] reads) ------------
    cost = pl.CostEstimate(
        flops=int(4 * N8 * C * H_pad),
        transcendentals=int(N8 * H_pad),
        bytes_accessed=int(N8 * C * xs
                           + grid[0] * (w1.size * ws + w2.size * ws
                                        + b1.size * 4 + b2.size * 4)
                           + N8 * C * os_),
    )

    kernel = functools.partial(_mlp_kernel,
                               approximate_gelu=approximate_gelu,
                               compute_dtype=cdt)

    out2 = pl.pallas_call(
        kernel,
        out_shape=jax.ShapeDtypeStruct((N8, C), out_dtype),
        grid_spec=pltpu.PrefetchScalarGridSpec(
            num_scalar_prefetch=0,
            grid=grid,
            in_specs=[
                pl.BlockSpec((tm_eff, C), lambda i, j: (i, 0)),     # x row tile
                pl.BlockSpec((C, th_eff), lambda i, j: (0, j)),     # W1 column tile
                pl.BlockSpec((1, th_eff), lambda i, j: (0, j)),     # b1 tile
                pl.BlockSpec((th_eff, C), lambda i, j: (j, 0)),     # W2 row tile
                pl.BlockSpec((1, C), lambda i, j: (0, 0)),          # b2
            ],
            out_specs=pl.BlockSpec((tm_eff, C), lambda i, j: (i, 0)),
            scratch_shapes=[pltpu.VMEM((tm_eff, C), jnp.float32)],
        ),
        compiler_params=pltpu.CompilerParams(
            dimension_semantics=("parallel", "arbitrary"),
            vmem_limit_bytes=vmem_limit),
        cost_estimate=cost,
        # NOTE: if profiling shows exposed weight DMA on v5e/v6e, add
        # pipeline_mode=pl.Buffered(3) to the W1/W2 BlockSpecs (not on v7x).
    )(x2, w1, b1, w2, b2)

    return out2[:N].reshape(B, T, C)


def init_params(key, n_embd, dtype=jnp.float32):
    """Deterministic init matching nn.Linear shapes (then transposed to (in,out))."""
    hidden = 4 * n_embd
    k1, k2, k3, k4 = jax.random.split(key, 4)
    # PyTorch nn.Linear default: U(-1/sqrt(fan_in), 1/sqrt(fan_in))
    lim1 = 1.0 / math.sqrt(n_embd)
    lim2 = 1.0 / math.sqrt(hidden)
    w_fc = jax.random.uniform(k1, (hidden, n_embd), dtype, -lim1, lim1).T    # (C, 4C)
    b_fc = jax.random.uniform(k2, (hidden,), dtype, -lim1, lim1)
    w_proj = jax.random.uniform(k3, (n_embd, hidden), dtype, -lim2, lim2).T  # (4C, C)
    b_proj = jax.random.uniform(k4, (n_embd,), dtype, -lim2, lim2)
    return w_fc, b_fc, w_proj, b_proj


def _reference(x, w_fc, b_fc, w_proj, b_proj, approximate=False):
    B, T, C = x.shape
    h = x.reshape(-1, C) @ w_fc + b_fc
    if approximate:
        h = jax.nn.gelu(h, approximate=True)
    else:
        h = 0.5 * h * (1.0 + lax.erf(h / math.sqrt(2.0)))
    return (h @ w_proj + b_proj).reshape(B, T, C)


if __name__ == "__main__":
    # config: n_embd=32, bias=True, dropout=0.0 (identity at inference)
    B, T, C = 2, 8, 32
    key = jax.random.PRNGKey(0)
    kx, kp = jax.random.split(key)
    x = jax.random.normal(kx, (B, T, C), jnp.float32)
    w_fc, b_fc, w_proj, b_proj = init_params(kp, C)

    ref = _reference(x, w_fc, b_fc, w_proj, b_proj)

    # f32 compute path (exact-erf GELU) — tight check against plain JAX.
    out_f32 = mlp_forward(x, w_fc, b_fc, w_proj, b_proj, compute_dtype=jnp.float32)
    jax.block_until_ready(out_f32)
    assert jnp.allclose(out_f32, ref, atol=1e-4, rtol=1e-4), "f32 mismatch vs reference"

    # bf16 MXU path with f32 accumulation; weights pre-cast ONCE (hoisted).
    bf16_params = prepare_params(w_fc, b_fc, w_proj, b_proj, jnp.bfloat16)
    out_bf16 = mlp_forward(x, *bf16_params)
    jax.block_until_ready(out_bf16)
    assert jnp.allclose(out_bf16, ref, atol=3e-2, rtol=3e-2), "bf16 mismatch vs reference"

    # Approximate (tanh / EUP) GELU path, f32 compute — check against tanh reference.
    out_tanh = mlp_forward(x, w_fc, b_fc, w_proj, b_proj,
                           compute_dtype=jnp.float32, approximate_gelu=True)
    jax.block_until_ready(out_tanh)
    ref_tanh = _reference(x, w_fc, b_fc, w_proj, b_proj, approximate=True)
    assert jnp.allclose(out_tanh, ref_tanh, atol=1e-4, rtol=1e-4), "tanh-GELU mismatch"

    print("KERNEL_OK")
</pallas_src>

<mosaic_0001>
module attributes {stable_mosaic.version = 11 : i64} {
  func.func @_mlp_kernel(%arg0: i32, %arg1: i32, %arg2: memref<16x32xf32, #tpu.memory_space<vmem>>, %arg3: memref<32x128xf32, #tpu.memory_space<vmem>>, %arg4: memref<1x128xf32, #tpu.memory_space<vmem>>, %arg5: memref<128x32xf32, #tpu.memory_space<vmem>>, %arg6: memref<1x32xf32, #tpu.memory_space<vmem>>, %arg7: memref<16x32xf32, #tpu.memory_space<vmem>>, %arg8: memref<16x32xf32, #tpu.memory_space<vmem>>) attributes {dimension_semantics = [#tpu.dimension_semantics<parallel>, #tpu.dimension_semantics<arbitrary>], iteration_bounds = array<i64: 1, 1>, scalar_prefetch = 0 : i64, scratch_operands = 1 : i64, tpu.core_type = #tpu.core_type<tc>, window_params = [{transform_indices = @transform_0, window_bounds = array<i64: 16, 32>}, {transform_indices = @transform_1, window_bounds = array<i64: 32, 128>}, {transform_indices = @transform_2, window_bounds = array<i64: 1, 128>}, {transform_indices = @transform_3, window_bounds = array<i64: 128, 32>}, {pipeline_mode = #tpu.pipeline_mode<synchronous>, transform_indices = @transform_4, window_bounds = array<i64: 1, 32>}, {transform_indices = @transform_5, window_bounds = array<i64: 16, 32>}]} {
    %c0_i32 = arith.constant 0 : i32
    %0 = arith.cmpi eq, %arg1, %c0_i32 : i32
    %1 = arith.extui %0 : i1 to i32
    %c0_i32_0 = arith.constant 0 : i32
    %2 = arith.cmpi ne, %1, %c0_i32_0 : i32
    scf.if %2 {
      %cst_18 = arith.constant 0.000000e+00 : f32
      %25 = vector.broadcast %cst_18 : f32 to vector<16x32xf32>
      %c0_19 = arith.constant 0 : index
      %c0_20 = arith.constant 0 : index
      %26 = vector.load %arg8[%c0_19, %c0_20] : memref<16x32xf32, #tpu.memory_space<vmem>>, vector<16x32xf32>
      tpu.vector_store %arg8[%c0_19, %c0_20], %25 {strides = array<i32>} : memref<16x32xf32, #tpu.memory_space<vmem>>, vector<16x32xf32>,
    } else {
    }
    %c0 = arith.constant 0 : index
    %c0_1 = arith.constant 0 : index
    %3 = vector.load %arg2[%c0, %c0_1] : memref<16x32xf32, #tpu.memory_space<vmem>>, vector<16x32xf32>
    %c0_2 = arith.constant 0 : index
    %c0_3 = arith.constant 0 : index
    %4 = vector.load %arg3[%c0_2, %c0_3] : memref<32x128xf32, #tpu.memory_space<vmem>>, vector<32x128xf32>
    %cst = arith.constant dense<0.000000e+00> : vector<16x128xf32>
    %5 = tpu.matmul %3, %4, %cst {dimension_numbers = #tpu.dot_dimension_numbers<[1], [0], [0], [1], [0, 0, 1, 1], [], []>} : vector<16x32xf32>, vector<32x128xf32>, vector<16x128xf32> -> vector<16x128xf32>
    %c0_4 = arith.constant 0 : index
    %c0_5 = arith.constant 0 : index
    %6 = vector.load %arg4[%c0_4, %c0_5] : memref<1x128xf32, #tpu.memory_space<vmem>>, vector<1x128xf32>
    %7 = vector.broadcast %6 : vector<1x128xf32> to vector<16x128xf32>
    %8 = arith.addf %5, %7 : vector<16x128xf32>
    %cst_6 = arith.constant 5.000000e-01 : f32
    %9 = vector.broadcast %cst_6 : f32 to vector<16x128xf32>
    %10 = arith.mulf %9, %8 : vector<16x128xf32>
    %cst_7 = arith.constant 0.707106769 : f32
    %11 = vector.broadcast %cst_7 : f32 to vector<16x128xf32>
    %12 = arith.mulf %8, %11 : vector<16x128xf32>
    %13 = math.erf %12 : vector<16x128xf32>
    %cst_8 = arith.constant 1.000000e+00 : f32
    %14 = vector.broadcast %cst_8 : f32 to vector<16x128xf32>
    %15 = arith.addf %14, %13 : vector<16x128xf32>
    %16 = arith.mulf %10, %15 : vector<16x128xf32>
    %c0_9 = arith.constant 0 : index
    %c0_10 = arith.constant 0 : index
    %17 = vector.load %arg8[%c0_9, %c0_10] : memref<16x32xf32, #tpu.memory_space<vmem>>, vector<16x32xf32>
    %c0_11 = arith.constant 0 : index
    %c0_12 = arith.constant 0 : index
    %18 = vector.load %arg5[%c0_11, %c0_12] : memref<128x32xf32, #tpu.memory_space<vmem>>, vector<128x32xf32>
    %cst_13 = arith.constant dense<0.000000e+00> : vector<16x32xf32>
    %19 = tpu.matmul %16, %18, %cst_13 {dimension_numbers = #tpu.dot_dimension_numbers<[1], [0], [0], [1], [0, 0, 1, 1], [], []>} : vector<16x128xf32>, vector<128x32xf32>, vector<16x32xf32> -> vector<16x32xf32>
    %20 = arith.addf %17, %19 : vector<16x32xf32>
    %c0_14 = arith.constant 0 : index
    %c0_15 = arith.constant 0 : index
    %21 = vector.load %arg8[%c0_14, %c0_15] : memref<16x32xf32, #tpu.memory_space<vmem>>, vector<16x32xf32>
    tpu.vector_store %arg8[%c0_14, %c0_15], %20 {strides = array<i32>} : memref<16x32xf32, #tpu.memory_space<vmem>>, vector<16x32xf32>,
    %c0_i32_16 = arith.constant 0 : i32
    %22 = arith.cmpi eq, %arg1, %c0_i32_16 : i32
    %23 = arith.extui %22 : i1 to i32
    %c0_i32_17 = arith.constant 0 : i32
    %24 = arith.cmpi ne, %23, %c0_i32_17 : i32
    scf.if %24 {
      %c0_18 = arith.constant 0 : index
      %c0_19 = arith.constant 0 : index
      %25 = vector.load %arg8[%c0_18, %c0_19] : memref<16x32xf32, #tpu.memory_space<vmem>>, vector<16x32xf32>
      %c0_20 = arith.constant 0 : index
      %c0_21 = arith.constant 0 : index
      %26 = vector.load %arg6[%c0_20, %c0_21] : memref<1x32xf32, #tpu.memory_space<vmem>>, vector<1x32xf32>
      %27 = vector.broadcast %26 : vector<1x32xf32> to vector<16x32xf32>
      %28 = arith.addf %25, %27 : vector<16x32xf32>
      %c0_22 = arith.constant 0 : index
      %c0_23 = arith.constant 0 : index
      %29 = vector.load %arg7[%c0_22, %c0_23] : memref<16x32xf32, #tpu.memory_space<vmem>>, vector<16x32xf32>
      tpu.vector_store %arg7[%c0_22, %c0_23], %28 {strides = array<i32>} : memref<16x32xf32, #tpu.memory_space<vmem>>, vector<16x32xf32>,
    } else {
    }
    return
  }
  func.func @transform_0(%arg0: i32, %arg1: i32) -> (i32, i32) {
    %c0_i32 = arith.constant 0 : i32
    %c0_i32_0 = arith.constant 0 : i32
    return %arg0, %c0_i32 : i32, i32
  }
  func.func @transform_1(%arg0: i32, %arg1: i32) -> (i32, i32) {
    %c0_i32 = arith.constant 0 : i32
    %c0_i32_0 = arith.constant 0 : i32
    return %c0_i32, %arg1 : i32, i32
  }
  func.func @transform_2(%arg0: i32, %arg1: i32) -> (i32, i32) {
    %c0_i32 = arith.constant 0 : i32
    %c0_i32_0 = arith.constant 0 : i32
    return %c0_i32, %arg1 : i32, i32
  }
  func.func @transform_3(%arg0: i32, %arg1: i32) -> (i32, i32) {
    %c0_i32 = arith.constant 0 : i32
    %c0_i32_0 = arith.constant 0 : i32
    return %arg1, %c0_i32 : i32, i32
  }
  func.func @transform_4(%arg0: i32, %arg1: i32) -> (i32, i32) {
    %c0_i32 = arith.constant 0 : i32
    %c0_i32_0 = arith.constant 0 : i32
    %c0_i32_1 = arith.constant 0 : i32
    return %c0_i32, %c0_i32_0 : i32, i32
  }
  func.func @transform_5(%arg0: i32, %arg1: i32) -> (i32, i32) {
    %c0_i32 = arith.constant 0 : i32
    %c0_i32_0 = arith.constant 0 : i32
    return %arg0, %c0_i32 : i32, i32
  }
}

</mosaic_0001>

<bundles_post_ra>
// kernel: tpu_custom_call.1
= control target key start
LH: loop header
LB: loop body
LE: loop exit
PB: predicated region body
PF: predicated region fallthrough
CT: control target
= control target key end

     0   :  { %vm25_vm0 = vcmask 261120   ;;  %s534_s0 = inlined_call_operand.vmem [shape: f32[16,32], index: 0, kind: input, shape index: {}]   ;;  %s535_s1 = inlined_call_operand.vmem [shape: f32[32,128], index: 1, kind: input, shape index: {}]   ;;  %s536_s2 = inlined_call_operand.vmem [shape: f32[1,128], index: 2, kind: input, shape index: {}]   ;;  %s537_s3 = inlined_call_operand.vmem [shape: f32[128,32], index: 3, kind: input, shape index: {}]   ;;  %s538_s4 = inlined_call_operand.vmem [shape: f32[1,32], index: 4, kind: input, shape index: {}]   ;;  %s539_s5 = inlined_call_operand.hbm [shape: f32[16,32], index: 5, kind: output, shape index: {}]  }
   0x1   :  { %v30_v0 = vld [vmem:[%s535_s1] sm:$0xff]  ;;  %v31_v1 = vld [vmem:[%s535_s1 + $0x8] sm:$0xff]  ;;  %v32_v2 = vld [vmem:[%s535_s1 + $0x10] sm:$0xff] }
   0x2   :  { %v336_v3 = vpack.c.bf16 %v31_v1, %v30_v0  ;;  %v33_v4 = vld [vmem:[%s535_s1 + $0x18] sm:$0xff]  ;;  %v28_v5 = vld [vmem:[%s534_s0] sm:$0xff]  ;;  %v136_v8 = vld [vmem:[%s537_s3 + $0x8] sm:$0xff] }
   0x3   :  { %v340_v6 = vpack.c.bf16 %v33_v4, %v32_v2  ;;  %298 = vmatprep.mubr.msk.f32.mxu0 %vm25_vm0, %v28_v5  ;;  %v135_v7 = vld [vmem:[%s537_s3] sm:$0xff]  ;;  %v137_v9 = vld [vmem:[%s537_s3 + $0x10] sm:$0xff]  ;;  %v138_v11 = vld [vmem:[%s537_s3 + $0x18] sm:$0xff] }
   0x4   :  { %337 = vmatprep.subr.bf16.mxu0 %v336_v3  ;;  %v344_v10 = vpack.c.bf16 %v136_v8, %v135_v7  ;;  %v348_v12 = vpack.c.bf16 %v138_v11, %v137_v9  ;;  %v139_v13 = vld [vmem:[%s537_s3 + $0x20] sm:$0xff]  ;;  %v140_v14 = vld [vmem:[%s537_s3 + $0x28] sm:$0xff] }
   0x5   :  { %339 = vmatpush3.bf16.msra.mxu0 %v336_v3 }
   0x6   :  { %10 = vsyncpa [#allocation4], 0  ;;  %341 = vmatprep.subr.bf16.mxu0 %v340_v6  ;;  %345 = vmatprep.subr.bf16.mxu1 %v344_v10  ;;  %v352_v15 = vpack.c.bf16 %v140_v14, %v139_v13  ;;  %v29_v16 = vld [vmem:[%s534_s0 + $0x8] sm:$0xff]  ;;  %v141_v17 = vld [vmem:[%s537_s3 + $0x30] sm:$0xff]  ;;  %v408_v32 = vmov 0.0   ;;  %s409_s11 = smov [#allocation3]  }
   0x7   :  { %347 = vmatpush3.bf16.msra.mxu1 %v344_v10  ;;  %v142_v18 = vld [vmem:[%s537_s3 + $0x38] sm:$0xff]  ;;  %v143_v20 = vld [vmem:[%s537_s3 + $0x40] sm:$0xff]  ;;  %v144_v21 = vld [vmem:[%s537_s3 + $0x48] sm:$0xff]  ;;  %27 = vst.msk [vmem:[#allocation2 + $0x8] sm:$0xff] %vm25_vm0, %v408_v32  ;;  %s251_s12 = sshll.u32 %s409_s11, 4  ;;  %s252_s12 = int_to_ptr.vmem [resolvable:$true] %s251_s12 }
   0x8   :  { %349 = vmatprep.subr.bf16.mxu1 %v348_v12  ;;  %v356_v19 = vpack.c.bf16 %v142_v18, %v141_v17  ;;  %v360_v22 = vpack.c.bf16 %v144_v21, %v143_v20  ;;  %v145_v23 = vld [vmem:[%s537_s3 + $0x50] sm:$0xff]  ;;  %v146_v24 = vld [vmem:[%s537_s3 + $0x58] sm:$0xff]  ;;  %v147_v26 = vld [vmem:[%s537_s3 + $0x60] sm:$0xff]  ;;  %26 = vst.msk [vmem:[#allocation2] sm:$0xff] %vm25_vm0, %v408_v32  ;;  %s384_s13 = scalar_lea.vmem %s252_s12, 256  ;;  %p389_p1 = scmp.lt.s32.totalorder %s252_s12, %s252_s12 }
   0x9   :  { %343 = vmatpush3.bf16.msra.mxu0 %v340_v6  ;;  %v364_v25 = vpack.c.bf16 %v146_v24, %v145_v23  ;;  %v148_v27 = vld [vmem:[%s537_s3 + $0x68] sm:$0xff]  ;;  %v149_v29 = vld [vmem:[%s537_s3 + $0x70] sm:$0xff]  ;;  %v150_v30 = vld [vmem:[%s537_s3 + $0x78] sm:$0xff]  ;;  %p385_p0 = scmp.ne.s32.totalorder %s252_s12, %s384_s13  ;;  %p390_p2 = scmp.lt.s32.totalorder %s384_s13, %s384_s13 }
   0xa   :  { %v368_v28 = vpack.c.bf16 %v148_v27, %v147_v26  ;;  %v372_v31 = vpack.c.bf16 %v150_v30, %v149_v29  ;;  %v262_v33 = vld [vmem:[%s536_s2] ss:$0 sm:$0xff] }
   0xb   :  { %351 = vmatpush3.bf16.msra.mxu1 %v348_v12  ;;  %v265_v54 = vld [vmem:[%s538_s4] ss:$0 sm:$0xff]  ;;  %p391_p3 = por %p390_p2, %p389_p1 }
   0xc   :  { %299 = vmatmul.mubr.msk.f32.vlgmr.msra.gmra.mrb[0].mxu0 %vm25_vm0, %v29_v16  ;;  %353 = vmatprep.subr.bf16.mxu1 %v352_v15 }
   0xd   :  { %p392_p4 = pnand %p391_p3, %p385_p0 }
   0xe   :  { %v134_v48 = vld [vmem:[#allocation2 + $0x8] sm:$0xff] }
   0xf   :  { %355 = vmatpush3.bf16.msra.mxu1 %v352_v15  ;;  %v133_v49 = vld [vmem:[#allocation2] sm:$0xff] }
  0x10   :  { %357 = vmatprep.subr.bf16.mxu1 %v356_v19 }
  0x13   :  { %359 = vmatpush3.bf16.msra.mxu1 %v356_v19 }
  0x14   :  { %361 = vmatprep.subr.bf16.mxu1 %v360_v22 }
  0x17   :  { %363 = vmatpush3.bf16.msra.mxu1 %v360_v22 }
  0x18   :  { %365 = vmatprep.subr.bf16.mxu1 %v364_v25 }
  0x1b   :  { %367 = vmatpush3.bf16.msra.mxu1 %v364_v25 }
  0x1c   :  { %369 = vmatprep.subr.bf16.mxu1 %v368_v28 }
  0x1f   :  { %371 = vmatpush3.bf16.msra.mxu1 %v368_v28 }
  0x20   :  { %373 = vmatprep.subr.bf16.mxu1 %v372_v31 }
  0x23   :  { %375 = vmatpush3.bf16.msra.mxu1 %v372_v31 }
  0xdf   :  { %v300_v34 = vpop.f32.mrb[0].mxu0 }
  0xe0   :  { %v120_v35 = vadd.f32 %v300_v34, %v262_v33  ;;  %v114_v36 = vpop.f32.mrb[1].mxu0 }
  0xe1   :  { %v115_v37 = vadd.f32 %v262_v33, %v114_v36 }
  0xe2   :  { %v126_v38 = vmul.f32 0.70710677, %v120_v35  ;;  %v124_v45 = vmul.f32 0.5, %v120_v35 }
  0xe3   :  { %v125_v39 = vmul.f32 0.70710677, %v115_v37  ;;  %v123_v43 = vmul.f32 0.5, %v115_v37 }
  0xe4   :  { %380 = verf.f32 %v126_v38 }
  0xe5   :  { %382 = verf.f32 %v125_v39 }
  0xee   :  { %v381_v40 = vpop.eup %380 }
  0xef   :  { %v383_v41 = vpop.eup %382  ;;  %v130_v42 = vadd.f32 1.0, %v381_v40 }
  0xf0   :  { %v129_v44 = vadd.f32 1.0, %v383_v41 }
  0xf1   :  { %v132_v47 = vmul.f32 %v130_v42, %v124_v45 }
  0xf2   :  { %v131_v46 = vmul.f32 %v129_v44, %v123_v43 }
  0xf4   :  { %333 = vmatprep.mubr.f32.mxu1 %v131_v46 }
  0xf5   :  { %334 = vmatmul.mubr.f32.vlgmr.msra.gmra.mrb[0].mxu1 %v132_v47 }
 0x1c8   :  { %v335_v50 = vpop.f32.mrb[0].mxu1 }
 0x1c9   :  { %v227_v51 = vadd.f32 %v335_v50, %v134_v48  ;;  %v217_v52 = vpop.f32.mrb[1].mxu1 }
 0x1ca   :  { %v226_v53 = vadd.f32 %v217_v52, %v133_v49 }
 0x1cb   :  { %229 = vst.msk [vmem:[#allocation2 + $0x8] sm:$0xff] %vm25_vm0, %v227_v51 }
 0x1cc   :  { %228 = vst.msk [vmem:[#allocation2] sm:$0xff] %vm25_vm0, %v226_v53 }
 0x1d2   :  { %v234_v55 = vld [vmem:[#allocation2 + $0x8] sm:$0xff] }
 0x1d3   :  { %v233_v56 = vld [vmem:[#allocation2] sm:$0xff]  ;;  %v243_v57 = vadd.f32 %v265_v54, %v234_v55 }
 0x1d4   :  { %v242_v58 = vadd.f32 %v265_v54, %v233_v56 }
 0x1d5   :  { %245 = vst.msk [vmem:[#allocation3 + $0x8] sm:$0xff] %vm25_vm0, %v243_v57 }
 0x1d6   :  { %244 = vst.msk [vmem:[#allocation3] sm:$0xff] %vm25_vm0, %v242_v58 }
 0x1d7   :  { %395 = shalt.err (!%p392_p4)
}
 0x1d8   :  { %s396_s15 = scalar_lea.hbm %s539_s5, 256 }
 0x1d9   :  { %p397_p5 = scmp.ne.s32.totalorder %s539_s5, %s396_s15  ;;  %p400_p6 = scmp.lt.u32.totalorder %s396_s15, %s539_s5 }
 0x1db   :  { %p402_p7 = pnand %p400_p6, %p397_p5 }
 0x1dd   :  { %405 = shalt.err (!%p402_p7)
}
 0x1de   :  { %s410_s20 = smov 128   ;;  %s411_s21 = smov 8  }
 0x1df   :  { %257 = dma.vmem_to_hbm [thread:$0]  %s252_s12, 256, %s539_s5, [#allocation4], %s410_s20, %s410_s20, %s411_s21  }
 0x1e0   :  { %406 = dma.done.wait [#allocation4], 256  }
 0x1e1   :  { %407 = vsyncadd [#allocation4], 4294967040 }
 0x1e2   :  { %261 = vsyncpa [#allocation4], 1 }

</bundles_post_ra>
